<compile_context>
chip_gen: v7x
topology: tpu7x:2x2x1
jax: 0.10.0
libtpu: 0.0.40
codegen_flags: <defaults>
</compile_context>

<pallas_src>
import functools

import numpy as np
import jax
import jax.numpy as jnp
from jax.experimental import pallas as pl
from jax.experimental.pallas import tpu as pltpu

NEG_SLOPE = 0.01   # nn.LeakyReLU default slope
BN_EPS = 1e-5      # nn.BatchNorm3d default eps


# ---------------- in-register flip along W (lane butterfly) ------------------------
def _flip_w_lanes(x, w_len):
    """Reverse values within contiguous groups of `w_len` along the last (lane) axis.

    x: (C, TS) with TS a multiple of w_len and W-groups aligned to lane 0.
    Reversal = XOR of the lane index with (w_len-1), done as a log2(w_len)
    butterfly of full-axis lane rolls + selects (XLU + VPU). Requires w_len
    to be a power of two.
    """
    if w_len <= 1:
        return x
    ts = x.shape[-1]
    axis = len(x.shape) - 1
    lane = jax.lax.broadcasted_iota(jnp.int32, x.shape, axis)
    k = w_len // 2
    while k >= 1:
        fwd = pltpu.roll(x, shift=(ts - k) % ts, axis=axis)   # value at lane i + k
        bwd = pltpu.roll(x, shift=k, axis=axis)               # value at lane i - k
        x = jnp.where((lane & k) == 0, fwd, bwd)              # value at lane i ^ k
        k //= 2
    return x


def _enc_and_diff(enc_ref, flip_ref, w_len):
    x = enc_ref[0]                                            # (C, TS) voxels on lanes
    if flip_ref is None:
        return x, x - _flip_w_lanes(x, w_len)                 # in-register flip
    return x, x - flip_ref[0]                                 # pre-flipped copy (general W)


# ---------------- Pass 1: per-block partial max of (enc - flip(enc, W)) ------------
def _max_kernel(*refs, w_len, has_flip):
    if has_flip:
        enc_ref, flip_ref, pmax_ref = refs
    else:
        enc_ref, pmax_ref = refs
        flip_ref = None
    _, diff = _enc_and_diff(enc_ref, flip_ref, w_len)
    # diff is antisymmetric in W -> global max == -global min; only max needed.
    pmax_ref[...] = jnp.full(pmax_ref.shape, jnp.max(diff), dtype=jnp.float32)


# ---------------- Pass 2: diff -> folded conv/BN -> LeakyReLU -> +enc -> cat(dec,.) -
def _sab_kernel(*refs, w_len, has_flip):
    if has_flip:
        enc_ref, flip_ref, dec_ref, wf_ref, cst_ref, out_ref = refs
    else:
        enc_ref, dec_ref, wf_ref, cst_ref, out_ref = refs
        flip_ref = None

    x, diff = _enc_and_diff(enc_ref, flip_ref, w_len)
    wf = wf_ref[...]                              # (C, C): inv * bn_scale * conv_w
    c_dim = wf.shape[0]

    # 1x1x1 conv over channels (normalization + BN scale already folded in).
    if c_dim <= 16:
        # tiny C: C broadcast FMAs over full-width vregs (VPU), skip the MXU
        acc = wf[:, 0:1] * diff[0:1, :]
        for c in range(1, c_dim):
            acc = acc + wf[:, c:c + 1] * diff[c:c + 1, :]
    else:
        acc = jnp.dot(wf, diff, preferred_element_type=jnp.float32)

    z = acc + cst_ref[...]                        # folded 0.5*rowsum(W) + bias + BN shift
    y = jnp.where(z >= 0, z, NEG_SLOPE * z)       # LeakyReLU

    out_ref[0, :c_dim, :] = dec_ref[0]            # cat((dec, enc + DIFF), dim=1)
    out_ref[0, c_dim:, :] = x + y


# ---------------- wrapper ----------------------------------------------------------
def _pick_spatial_tile(s, w, cap):
    """Largest multiple-of-128 divisor of s (also a multiple of w) up to cap."""
    cap = max(cap, 128)
    if s % 128 == 0:
        for k in range(min(s, cap) // 128, 0, -1):
            cand = 128 * k
            if s % cand == 0 and cand % w == 0:
                return cand
    return s   # fallback: full spatial extent per block (always a multiple of w)


def sab_forward(enc, dec, conv_w, conv_b, bn_gamma, bn_beta, bn_mean, bn_var,
                *, vmem_block_budget=12 * 1024 * 1024):
    """enc, dec: NCDHW float32. conv_w: (Cout, Cin) (1x1x1 kernel squeezed)."""
    N, C, D, H, W = enc.shape
    assert dec.shape == enc.shape
    assert conv_w.shape == (C, C), "SAB residual add requires out_dim == in_dim"

    pow2_w = W >= 1 and (W & (W - 1)) == 0
    has_flip = not pow2_w

    S = D * H * W
    # VMEM budget for pass 2: enc (+flip) + dec in, 2C out, double buffered, f32.
    ch_equiv = (3 * C if has_flip else 2 * C) + 2 * C
    cap = max(128, vmem_block_budget // (2 * 4 * ch_equiv))
    ts = _pick_spatial_tile(S, W, cap)
    n_s = S // ts
    nb = N * n_s

    enc3 = enc.reshape(N, C, S).astype(jnp.float32)   # free: no data movement
    dec3 = dec.reshape(N, C, S).astype(jnp.float32)

    blk_in = pl.BlockSpec((1, C, ts), lambda n, j: (n, 0, j))

    p1_inputs = [enc3]
    p1_specs = [blk_in]
    if has_flip:
        # General (non power-of-two) W: flip once in XLA, stream it alongside enc.
        enc3_flip = jnp.flip(enc, axis=4).reshape(N, C, S).astype(jnp.float32)
        p1_inputs.append(enc3_flip)
        p1_specs.append(blk_in)

    # ---- pass 1: per-block partial maxima (fully parallel grid) ----
    partial = pl.pallas_call(
        functools.partial(_max_kernel, w_len=W, has_flip=has_flip),
        out_shape=jax.ShapeDtypeStruct((8, nb * 128), jnp.float32),
        grid_spec=pltpu.PrefetchScalarGridSpec(
            num_scalar_prefetch=0,
            grid=(N, n_s),
            in_specs=p1_specs,
            out_specs=pl.BlockSpec((8, 128), lambda n, j: (0, n * n_s + j))),
        compiler_params=pltpu.CompilerParams(
            dimension_semantics=("parallel", "parallel"),
            vmem_limit_bytes=32 * 1024 * 1024),
    )(*p1_inputs)

    maxv = jnp.max(partial)                       # tiny reduction of the partials
    denom = 2.0 * maxv                            # max - min == 2 * max (antisymmetry)
    inv = jnp.where(denom != 0.0, 1.0 / denom, 0.0)   # guard degenerate (symmetric) input

    # ---- fold normalize + conv bias + BatchNorm (inference) into weight/shift ----
    bn_scale = bn_gamma / jnp.sqrt(bn_var + BN_EPS)
    bn_shift = bn_beta - bn_mean * bn_scale
    wf = (inv * bn_scale[:, None] * conv_w).astype(jnp.float32)              # (C, C)
    cst = (bn_scale * (0.5 * jnp.sum(conv_w, axis=1) + conv_b) + bn_shift)
    cst = cst.astype(jnp.float32)[:, None]                                   # (C, 1)

    p2_inputs = list(p1_inputs) + [dec3, wf, cst]
    p2_specs = list(p1_specs) + [blk_in,
                                 pl.BlockSpec((C, C), lambda n, j: (0, 0)),
                                 pl.BlockSpec((C, 1), lambda n, j: (0, 0))]

    # ---- pass 2: fused everything, output already concatenated with dec ----
    out3 = pl.pallas_call(
        functools.partial(_sab_kernel, w_len=W, has_flip=has_flip),
        out_shape=jax.ShapeDtypeStruct((N, 2 * C, S), jnp.float32),
        grid_spec=pltpu.PrefetchScalarGridSpec(
            num_scalar_prefetch=0,
            grid=(N, n_s),
            in_specs=p2_specs,
            out_specs=pl.BlockSpec((1, 2 * C, ts), lambda n, j: (n, 0, j))),
        compiler_params=pltpu.CompilerParams(
            dimension_semantics=("parallel", "parallel"),
            vmem_limit_bytes=32 * 1024 * 1024),
    )(*p2_inputs)

    return out3.reshape(N, 2 * C, D, H, W)


# ---------------- pure-JAX reference (for correctness check) -----------------------
def sab_reference(enc, dec, conv_w, conv_b, bn_gamma, bn_beta, bn_mean, bn_var):
    diff = enc - jnp.flip(enc, axis=4)
    diff = (diff - jnp.min(diff)) / (jnp.max(diff) - jnp.min(diff))
    conv = jnp.einsum('ncdhw,oc->nodhw', diff, conv_w) + conv_b[None, :, None, None, None]
    bn = ((conv - bn_mean[None, :, None, None, None])
          / jnp.sqrt(bn_var + BN_EPS)[None, :, None, None, None]
          * bn_gamma[None, :, None, None, None] + bn_beta[None, :, None, None, None])
    y = jnp.where(bn >= 0, bn, NEG_SLOPE * bn)
    return jnp.concatenate([dec, enc + y], axis=1)


def _make_params(key, c):
    ks = jax.random.split(key, 6)
    conv_w = 0.3 * jax.random.normal(ks[0], (c, c), jnp.float32)
    conv_b = 0.1 * jax.random.normal(ks[1], (c,), jnp.float32)
    bn_gamma = 1.0 + 0.1 * jax.random.normal(ks[2], (c,), jnp.float32)
    bn_beta = 0.1 * jax.random.normal(ks[3], (c,), jnp.float32)
    bn_mean = 0.1 * jax.random.normal(ks[4], (c,), jnp.float32)
    bn_var = jax.random.uniform(ks[5], (c,), jnp.float32, minval=0.5, maxval=1.5)
    return conv_w, conv_b, bn_gamma, bn_beta, bn_mean, bn_var


def _run_case(key, shape):
    n, c, d, h, w = shape
    k_enc, k_dec, k_par = jax.random.split(key, 3)
    enc = jax.random.normal(k_enc, shape, jnp.float32)
    dec = jax.random.normal(k_dec, shape, jnp.float32)
    params = _make_params(k_par, c)

    out = jax.jit(sab_forward)(enc, dec, *params)
    out = jax.block_until_ready(out)

    ref = sab_reference(enc, dec, *params)
    assert out.shape == (n, 2 * c, d, h, w), out.shape
    err = np.max(np.abs(np.asarray(out) - np.asarray(ref)))
    assert np.allclose(np.asarray(out), np.asarray(ref), rtol=1e-3, atol=1e-3), \
        f"shape {shape}: max abs err {err}"


if __name__ == "__main__":
    key = jax.random.PRNGKey(0)
    k1, k2 = jax.random.split(key, 2)

    # Main case: power-of-two W -> in-register lane-butterfly flip path.
    _run_case(k1, (2, 8, 4, 8, 16))   # in_dim = out_dim = 8, kerStride = (1,1,1)
    # Fallback case: non power-of-two W -> pre-flipped-copy path.
    _run_case(k2, (1, 4, 2, 3, 12))

    print("KERNEL_OK")
</pallas_src>

<mosaic_0001>
module attributes {stable_mosaic.version = 11 : i64} {
  func.func @_max_kernel(%arg0: i32, %arg1: i32, %arg2: memref<1x8x512xf32, #tpu.memory_space<vmem>>, %arg3: memref<8x128xf32, #tpu.memory_space<vmem>>) attributes {dimension_semantics = [#tpu.dimension_semantics<parallel>, #tpu.dimension_semantics<parallel>], iteration_bounds = array<i64: 2, 1>, scalar_prefetch = 0 : i64, scratch_operands = 0 : i64, tpu.core_type = #tpu.core_type<tc>, window_params = [{transform_indices = @transform_0, window_bounds = array<i64: 1, 8, 512>}, {transform_indices = @transform_1, window_bounds = array<i64: 8, 128>}]} {
    %c0 = arith.constant 0 : index
    %c0_0 = arith.constant 0 : index
    %c0_1 = arith.constant 0 : index
    %0 = vector.load %arg2[%c0, %c0_0, %c0_1] : memref<1x8x512xf32, #tpu.memory_space<vmem>>, vector<1x8x512xf32>
    %1 = vector.shape_cast %0 : vector<1x8x512xf32> to vector<8x512xf32>
    %2 = tpu.iota {dimensions = array<i32: 1>} : vector<8x512xi32>
    %c504_i32 = arith.constant 504 : i32
    %3 = tpu.dynamic_rotate %1 by %c504_i32 dim 1 : vector<8x512xf32>, i32 -> vector<8x512xf32>
    %c8_i32 = arith.constant 8 : i32
    %4 = tpu.dynamic_rotate %1 by %c8_i32 dim 1 : vector<8x512xf32>, i32 -> vector<8x512xf32>
    %c8_i32_2 = arith.constant 8 : i32
    %5 = vector.broadcast %c8_i32_2 : i32 to vector<8x512xi32>
    %6 = arith.andi %2, %5 : vector<8x512xi32>
    %c0_i32 = arith.constant 0 : i32
    %7 = vector.broadcast %c0_i32 : i32 to vector<8x512xi32>
    %8 = arith.cmpi eq, %6, %7 : vector<8x512xi32>
    %9 = arith.select %8, %3, %4 : vector<8x512xi1>, vector<8x512xf32>
    %c508_i32 = arith.constant 508 : i32
    %10 = tpu.dynamic_rotate %9 by %c508_i32 dim 1 : vector<8x512xf32>, i32 -> vector<8x512xf32>
    %c4_i32 = arith.constant 4 : i32
    %11 = tpu.dynamic_rotate %9 by %c4_i32 dim 1 : vector<8x512xf32>, i32 -> vector<8x512xf32>
    %c4_i32_3 = arith.constant 4 : i32
    %12 = vector.broadcast %c4_i32_3 : i32 to vector<8x512xi32>
    %13 = arith.andi %2, %12 : vector<8x512xi32>
    %c0_i32_4 = arith.constant 0 : i32
    %14 = vector.broadcast %c0_i32_4 : i32 to vector<8x512xi32>
    %15 = arith.cmpi eq, %13, %14 : vector<8x512xi32>
    %16 = arith.select %15, %10, %11 : vector<8x512xi1>, vector<8x512xf32>
    %c510_i32 = arith.constant 510 : i32
    %17 = tpu.dynamic_rotate %16 by %c510_i32 dim 1 : vector<8x512xf32>, i32 -> vector<8x512xf32>
    %c2_i32 = arith.constant 2 : i32
    %18 = tpu.dynamic_rotate %16 by %c2_i32 dim 1 : vector<8x512xf32>, i32 -> vector<8x512xf32>
    %c2_i32_5 = arith.constant 2 : i32
    %19 = vector.broadcast %c2_i32_5 : i32 to vector<8x512xi32>
    %20 = arith.andi %2, %19 : vector<8x512xi32>
    %c0_i32_6 = arith.constant 0 : i32
    %21 = vector.broadcast %c0_i32_6 : i32 to vector<8x512xi32>
    %22 = arith.cmpi eq, %20, %21 : vector<8x512xi32>
    %23 = arith.select %22, %17, %18 : vector<8x512xi1>, vector<8x512xf32>
    %c511_i32 = arith.constant 511 : i32
    %24 = tpu.dynamic_rotate %23 by %c511_i32 dim 1 : vector<8x512xf32>, i32 -> vector<8x512xf32>
    %c1_i32 = arith.constant 1 : i32
    %25 = tpu.dynamic_rotate %23 by %c1_i32 dim 1 : vector<8x512xf32>, i32 -> vector<8x512xf32>
    %c1_i32_7 = arith.constant 1 : i32
    %26 = vector.broadcast %c1_i32_7 : i32 to vector<8x512xi32>
    %27 = arith.andi %2, %26 : vector<8x512xi32>
    %c0_i32_8 = arith.constant 0 : i32
    %28 = vector.broadcast %c0_i32_8 : i32 to vector<8x512xi32>
    %29 = arith.cmpi eq, %27, %28 : vector<8x512xi32>
    %30 = arith.select %29, %24, %25 : vector<8x512xi1>, vector<8x512xf32>
    %31 = arith.subf %1, %30 : vector<8x512xf32>
    %32 = vector.shape_cast %31 : vector<8x512xf32> to vector<1x8x512xf32>
    %cst = arith.constant dense<0xFF800000> : vector<1xf32>
    %33 = vector.multi_reduction <maximumf>, %32, %cst [1, 2] : vector<1x8x512xf32> to vector<1xf32>
    %34 = vector.shape_cast %33 : vector<1xf32> to vector<1x1x1xf32>
    %35 = vector.extract %34[0, 0, 0] : f32 from vector<1x1x1xf32>
    %36 = vector.broadcast %35 : f32 to vector<8x128xf32>
    %c0_9 = arith.constant 0 : index
    %c0_10 = arith.constant 0 : index
    %37 = vector.load %arg3[%c0_9, %c0_10] : memref<8x128xf32, #tpu.memory_space<vmem>>, vector<8x128xf32>
    tpu.vector_store %arg3[%c0_9, %c0_10], %36 {strides = array<i32>} : memref<8x128xf32, #tpu.memory_space<vmem>>, vector<8x128xf32>,
    return
  }
  func.func @transform_0(%arg0: i32, %arg1: i32) -> (i32, i32, i32) {
    %c0_i32 = arith.constant 0 : i32
    %c0_i32_0 = arith.constant 0 : i32
    return %arg0, %c0_i32, %arg1 : i32, i32, i32
  }
  func.func @transform_1(%arg0: i32, %arg1: i32) -> (i32, i32) {
    %c1_i32 = arith.constant 1 : i32
    %0 = arith.muli %arg0, %c1_i32 : i32
    %1 = arith.addi %0, %arg1 : i32
    %c0_i32 = arith.constant 0 : i32
    %c0_i32_0 = arith.constant 0 : i32
    return %c0_i32, %1 : i32, i32
  }
}

module attributes {stable_mosaic.version = 11 : i64} {
  func.func @_sab_kernel(%arg0: i32, %arg1: i32, %arg2: memref<1x8x512xf32, #tpu.memory_space<vmem>>, %arg3: memref<1x8x512xf32, #tpu.memory_space<vmem>>, %arg4: memref<8x8xf32, #tpu.memory_space<vmem>>, %arg5: memref<8x1xf32, #tpu.memory_space<vmem>>, %arg6: memref<1x16x512xf32, #tpu.memory_space<vmem>>) attributes {dimension_semantics = [#tpu.dimension_semantics<parallel>, #tpu.dimension_semantics<parallel>], iteration_bounds = array<i64: 2, 1>, scalar_prefetch = 0 : i64, scratch_operands = 0 : i64, tpu.core_type = #tpu.core_type<tc>, window_params = [{transform_indices = @transform_0, window_bounds = array<i64: 1, 8, 512>}, {transform_indices = @transform_1, window_bounds = array<i64: 1, 8, 512>}, {pipeline_mode = #tpu.pipeline_mode<synchronous>, transform_indices = @transform_2, window_bounds = array<i64: 8, 8>}, {pipeline_mode = #tpu.pipeline_mode<synchronous>, transform_indices = @transform_3, window_bounds = array<i64: 8, 1>}, {transform_indices = @transform_4, window_bounds = array<i64: 1, 16, 512>}]} {
    %c0 = arith.constant 0 : index
    %c0_0 = arith.constant 0 : index
    %c0_1 = arith.constant 0 : index
    %0 = vector.load %arg2[%c0, %c0_0, %c0_1] : memref<1x8x512xf32, #tpu.memory_space<vmem>>, vector<1x8x512xf32>
    %1 = vector.shape_cast %0 : vector<1x8x512xf32> to vector<8x512xf32>
    %2 = tpu.iota {dimensions = array<i32: 1>} : vector<8x512xi32>
    %c504_i32 = arith.constant 504 : i32
    %3 = tpu.dynamic_rotate %1 by %c504_i32 dim 1 : vector<8x512xf32>, i32 -> vector<8x512xf32>
    %c8_i32 = arith.constant 8 : i32
    %4 = tpu.dynamic_rotate %1 by %c8_i32 dim 1 : vector<8x512xf32>, i32 -> vector<8x512xf32>
    %c8_i32_2 = arith.constant 8 : i32
    %5 = vector.broadcast %c8_i32_2 : i32 to vector<8x512xi32>
    %6 = arith.andi %2, %5 : vector<8x512xi32>
    %c0_i32 = arith.constant 0 : i32
    %7 = vector.broadcast %c0_i32 : i32 to vector<8x512xi32>
    %8 = arith.cmpi eq, %6, %7 : vector<8x512xi32>
    %9 = arith.select %8, %3, %4 : vector<8x512xi1>, vector<8x512xf32>
    %c508_i32 = arith.constant 508 : i32
    %10 = tpu.dynamic_rotate %9 by %c508_i32 dim 1 : vector<8x512xf32>, i32 -> vector<8x512xf32>
    %c4_i32 = arith.constant 4 : i32
    %11 = tpu.dynamic_rotate %9 by %c4_i32 dim 1 : vector<8x512xf32>, i32 -> vector<8x512xf32>
    %c4_i32_3 = arith.constant 4 : i32
    %12 = vector.broadcast %c4_i32_3 : i32 to vector<8x512xi32>
    %13 = arith.andi %2, %12 : vector<8x512xi32>
    %c0_i32_4 = arith.constant 0 : i32
    %14 = vector.broadcast %c0_i32_4 : i32 to vector<8x512xi32>
    %15 = arith.cmpi eq, %13, %14 : vector<8x512xi32>
    %16 = arith.select %15, %10, %11 : vector<8x512xi1>, vector<8x512xf32>
    %c510_i32 = arith.constant 510 : i32
    %17 = tpu.dynamic_rotate %16 by %c510_i32 dim 1 : vector<8x512xf32>, i32 -> vector<8x512xf32>
    %c2_i32 = arith.constant 2 : i32
    %18 = tpu.dynamic_rotate %16 by %c2_i32 dim 1 : vector<8x512xf32>, i32 -> vector<8x512xf32>
    %c2_i32_5 = arith.constant 2 : i32
    %19 = vector.broadcast %c2_i32_5 : i32 to vector<8x512xi32>
    %20 = arith.andi %2, %19 : vector<8x512xi32>
    %c0_i32_6 = arith.constant 0 : i32
    %21 = vector.broadcast %c0_i32_6 : i32 to vector<8x512xi32>
    %22 = arith.cmpi eq, %20, %21 : vector<8x512xi32>
    %23 = arith.select %22, %17, %18 : vector<8x512xi1>, vector<8x512xf32>
    %c511_i32 = arith.constant 511 : i32
    %24 = tpu.dynamic_rotate %23 by %c511_i32 dim 1 : vector<8x512xf32>, i32 -> vector<8x512xf32>
    %c1_i32 = arith.constant 1 : i32
    %25 = tpu.dynamic_rotate %23 by %c1_i32 dim 1 : vector<8x512xf32>, i32 -> vector<8x512xf32>
    %c1_i32_7 = arith.constant 1 : i32
    %26 = vector.broadcast %c1_i32_7 : i32 to vector<8x512xi32>
    %27 = arith.andi %2, %26 : vector<8x512xi32>
    %c0_i32_8 = arith.constant 0 : i32
    %28 = vector.broadcast %c0_i32_8 : i32 to vector<8x512xi32>
    %29 = arith.cmpi eq, %27, %28 : vector<8x512xi32>
    %30 = arith.select %29, %24, %25 : vector<8x512xi1>, vector<8x512xf32>
    %31 = arith.subf %1, %30 : vector<8x512xf32>
    %c0_9 = arith.constant 0 : index
    %c0_10 = arith.constant 0 : index
    %32 = vector.load %arg4[%c0_9, %c0_10] : memref<8x8xf32, #tpu.memory_space<vmem>>, vector<8x8xf32>
    %33 = vector.extract_strided_slice %32 {offsets = [0, 0], sizes = [8, 1], strides = [1, 1]} : vector<8x8xf32> to vector<8x1xf32>
    %34 = vector.extract_strided_slice %31 {offsets = [0, 0], sizes = [1, 512], strides = [1, 1]} : vector<8x512xf32> to vector<1x512xf32>
    %35 = vector.broadcast %33 : vector<8x1xf32> to vector<8x512xf32>
    %36 = vector.broadcast %34 : vector<1x512xf32> to vector<8x512xf32>
    %37 = arith.mulf %35, %36 : vector<8x512xf32>
    %38 = vector.extract_strided_slice %32 {offsets = [0, 1], sizes = [8, 1], strides = [1, 1]} : vector<8x8xf32> to vector<8x1xf32>
    %39 = vector.extract_strided_slice %31 {offsets = [1, 0], sizes = [1, 512], strides = [1, 1]} : vector<8x512xf32> to vector<1x512xf32>
    %40 = vector.broadcast %38 : vector<8x1xf32> to vector<8x512xf32>
    %41 = vector.broadcast %39 : vector<1x512xf32> to vector<8x512xf32>
    %42 = arith.mulf %40, %41 : vector<8x512xf32>
    %43 = arith.addf %37, %42 : vector<8x512xf32>
    %44 = vector.extract_strided_slice %32 {offsets = [0, 2], sizes = [8, 1], strides = [1, 1]} : vector<8x8xf32> to vector<8x1xf32>
    %45 = vector.extract_strided_slice %31 {offsets = [2, 0], sizes = [1, 512], strides = [1, 1]} : vector<8x512xf32> to vector<1x512xf32>
    %46 = vector.broadcast %44 : vector<8x1xf32> to vector<8x512xf32>
    %47 = vector.broadcast %45 : vector<1x512xf32> to vector<8x512xf32>
    %48 = arith.mulf %46, %47 : vector<8x512xf32>
    %49 = arith.addf %43, %48 : vector<8x512xf32>
    %50 = vector.extract_strided_slice %32 {offsets = [0, 3], sizes = [8, 1], strides = [1, 1]} : vector<8x8xf32> to vector<8x1xf32>
    %51 = vector.extract_strided_slice %31 {offsets = [3, 0], sizes = [1, 512], strides = [1, 1]} : vector<8x512xf32> to vector<1x512xf32>
    %52 = vector.broadcast %50 : vector<8x1xf32> to vector<8x512xf32>
    %53 = vector.broadcast %51 : vector<1x512xf32> to vector<8x512xf32>
    %54 = arith.mulf %52, %53 : vector<8x512xf32>
    %55 = arith.addf %49, %54 : vector<8x512xf32>
    %56 = vector.extract_strided_slice %32 {offsets = [0, 4], sizes = [8, 1], strides = [1, 1]} : vector<8x8xf32> to vector<8x1xf32>
    %57 = vector.extract_strided_slice %31 {offsets = [4, 0], sizes = [1, 512], strides = [1, 1]} : vector<8x512xf32> to vector<1x512xf32>
    %58 = vector.broadcast %56 : vector<8x1xf32> to vector<8x512xf32>
    %59 = vector.broadcast %57 : vector<1x512xf32> to vector<8x512xf32>
    %60 = arith.mulf %58, %59 : vector<8x512xf32>
    %61 = arith.addf %55, %60 : vector<8x512xf32>
    %62 = vector.extract_strided_slice %32 {offsets = [0, 5], sizes = [8, 1], strides = [1, 1]} : vector<8x8xf32> to vector<8x1xf32>
    %63 = vector.extract_strided_slice %31 {offsets = [5, 0], sizes = [1, 512], strides = [1, 1]} : vector<8x512xf32> to vector<1x512xf32>
    %64 = vector.broadcast %62 : vector<8x1xf32> to vector<8x512xf32>
    %65 = vector.broadcast %63 : vector<1x512xf32> to vector<8x512xf32>
    %66 = arith.mulf %64, %65 : vector<8x512xf32>
    %67 = arith.addf %61, %66 : vector<8x512xf32>
    %68 = vector.extract_strided_slice %32 {offsets = [0, 6], sizes = [8, 1], strides = [1, 1]} : vector<8x8xf32> to vector<8x1xf32>
    %69 = vector.extract_strided_slice %31 {offsets = [6, 0], sizes = [1, 512], strides = [1, 1]} : vector<8x512xf32> to vector<1x512xf32>
    %70 = vector.broadcast %68 : vector<8x1xf32> to vector<8x512xf32>
    %71 = vector.broadcast %69 : vector<1x512xf32> to vector<8x512xf32>
    %72 = arith.mulf %70, %71 : vector<8x512xf32>
    %73 = arith.addf %67, %72 : vector<8x512xf32>
    %74 = vector.extract_strided_slice %32 {offsets = [0, 7], sizes = [8, 1], strides = [1, 1]} : vector<8x8xf32> to vector<8x1xf32>
    %75 = vector.extract_strided_slice %31 {offsets = [7, 0], sizes = [1, 512], strides = [1, 1]} : vector<8x512xf32> to vector<1x512xf32>
    %76 = vector.broadcast %74 : vector<8x1xf32> to vector<8x512xf32>
    %77 = vector.broadcast %75 : vector<1x512xf32> to vector<8x512xf32>
    %78 = arith.mulf %76, %77 : vector<8x512xf32>
    %79 = arith.addf %73, %78 : vector<8x512xf32>
    %c0_11 = arith.constant 0 : index
    %c0_12 = arith.constant 0 : index
    %80 = vector.load %arg5[%c0_11, %c0_12] : memref<8x1xf32, #tpu.memory_space<vmem>>, vector<8x1xf32>
    %81 = vector.broadcast %80 : vector<8x1xf32> to vector<8x512xf32>
    %82 = arith.addf %79, %81 : vector<8x512xf32>
    %cst = arith.constant 0.000000e+00 : f32
    %83 = vector.broadcast %cst : f32 to vector<8x512xf32>
    %84 = arith.cmpf oge, %82, %83 : vector<8x512xf32>
    %cst_13 = arith.constant 0.00999999977 : f32
    %85 = vector.broadcast %cst_13 : f32 to vector<8x512xf32>
    %86 = arith.mulf %85, %82 : vector<8x512xf32>
    %87 = arith.select %84, %82, %86 : vector<8x512xi1>, vector<8x512xf32>
    %c0_14 = arith.constant 0 : index
    %c0_15 = arith.constant 0 : index
    %c0_16 = arith.constant 0 : index
    %88 = vector.load %arg3[%c0_14, %c0_15, %c0_16] : memref<1x8x512xf32, #tpu.memory_space<vmem>>, vector<1x8x512xf32>
    %89 = vector.shape_cast %88 : vector<1x8x512xf32> to vector<8x512xf32>
    %c0_17 = arith.constant 0 : index
    %c0_18 = arith.constant 0 : index
    %c0_19 = arith.constant 0 : index
    %90 = vector.load %arg6[%c0_17, %c0_18, %c0_19] : memref<1x16x512xf32, #tpu.memory_space<vmem>>, vector<1x8x512xf32>
    %91 = vector.shape_cast %90 : vector<1x8x512xf32> to vector<8x512xf32>
    %92 = vector.shape_cast %89 : vector<8x512xf32> to vector<1x8x512xf32>
    tpu.vector_store %arg6[%c0_17, %c0_18, %c0_19], %92 {strides = array<i32>} : memref<1x16x512xf32, #tpu.memory_space<vmem>>, vector<1x8x512xf32>,
    %93 = arith.addf %1, %87 : vector<8x512xf32>
    %c0_20 = arith.constant 0 : index
    %c8 = arith.constant 8 : index
    %c0_21 = arith.constant 0 : index
    %94 = vector.load %arg6[%c0_20, %c8, %c0_21] : memref<1x16x512xf32, #tpu.memory_space<vmem>>, vector<1x8x512xf32>
    %95 = vector.shape_cast %94 : vector<1x8x512xf32> to vector<8x512xf32>
    %96 = vector.shape_cast %93 : vector<8x512xf32> to vector<1x8x512xf32>
    tpu.vector_store %arg6[%c0_20, %c8, %c0_21], %96 {strides = array<i32>} : memref<1x16x512xf32, #tpu.memory_space<vmem>>, vector<1x8x512xf32>,
    return
  }
  func.func @transform_0(%arg0: i32, %arg1: i32) -> (i32, i32, i32) {
    %c0_i32 = arith.constant 0 : i32
    %c0_i32_0 = arith.constant 0 : i32
    return %arg0, %c0_i32, %arg1 : i32, i32, i32
  }
  func.func @transform_1(%arg0: i32, %arg1: i32) -> (i32, i32, i32) {
    %c0_i32 = arith.constant 0 : i32
    %c0_i32_0 = arith.constant 0 : i32
    return %arg0, %c0_i32, %arg1 : i32, i32, i32
  }
  func.func @transform_2(%arg0: i32, %arg1: i32) -> (i32, i32) {
    %c0_i32 = arith.constant 0 : i32
    %c0_i32_0 = arith.constant 0 : i32
    %c0_i32_1 = arith.constant 0 : i32
    return %c0_i32, %c0_i32_0 : i32, i32
  }
  func.func @transform_3(%arg0: i32, %arg1: i32) -> (i32, i32) {
    %c0_i32 = arith.constant 0 : i32
    %c0_i32_0 = arith.constant 0 : i32
    %c0_i32_1 = arith.constant 0 : i32
    return %c0_i32, %c0_i32_0 : i32, i32
  }
  func.func @transform_4(%arg0: i32, %arg1: i32) -> (i32, i32, i32) {
    %c0_i32 = arith.constant 0 : i32
    %c0_i32_0 = arith.constant 0 : i32
    return %arg0, %c0_i32, %arg1 : i32, i32, i32
  }
}

</mosaic_0001>

<bundles_post_ra>
// kernel: sab_forward.2
= control target key start
LH: loop header
LB: loop body
LE: loop exit
PB: predicated region body
PF: predicated region fallthrough
CT: control target
= control target key end

     0   :  { %s485_s6 = smov 0   ;;  %s487_s7 = smov 0   ;;  %s653_s0 = inlined_call_operand.vmem [shape: f32[2,8,512], index: 0, kind: input, shape index: {}]   ;;  %s654_s1 = inlined_call_operand.vmem [shape: f32[8,256], index: 1, kind: output, shape index: {}]  }
   0x1   :  { %s489_s8 = smov 0  }
   0x2 LB: > { %s23_s9 = sadd.s32 1, %s461_s7  ;;  %p402_p0 = scmp.ge.s32.totalorder %s465_s8, 1  ;;  %s465_s8 = sphi %s489_s8, %s11_s8   ;;  %s461_s7 = sphi %s487_s7, %s660_s7   ;;  %s457_s6 = sphi %s485_s6, %s659_s6  }
   0x3   : > { %p25_p1 = scmp.ge.s32.totalorder %s23_s9, 2  ;;  %p108_p2 = scmp.lt.s32.totalorder %s465_s8, 3 }
   0x5   : > { %s662_s9 = smov (%p25_p1, %s23_s9), 0  ;;  %p109_p3 = pnand %p402_p0, %p108_p2 }
   0x6   : > { %p133_p4 = scmp.lt.s32.totalorder (!%p109_p3), %s457_s6, 1  ;;  %s467_s14 = smov (!%p109_p3), 120   ;;  %v152_v4 = vlaneseq (!%p109_p3) }
   0x7   : > { %112 = sbr.rel (%p109_p3) target bundleno = 742 (0x2e6), region = 24  ;;  %s468_s15 = smov (!%p109_p3), 8  }
   0x8   : > { %v525_v5 = vand.u32 (!%p109_p3), 127, %v152_v4  ;;  %s469_s16 = smov (!%p109_p3), 124   ;;  %s470_s17 = smov (!%p109_p3), 4  }
   0x9   : > { %s471_s18 = smov (!%p109_p3), 126   ;;  %s472_s19 = smov (!%p109_p3), 2  }
   0xa   : > { %v528_v6 = vadd.s32 (!%p109_p3), 128, %v525_v5  ;;  %v532_v10 = vadd.s32 (!%p109_p3), 384, %v525_v5  ;;  %vm165_vm0 = vcmp.lt.s32.totalorder (!%p109_p3), %v525_v5, 120  ;;  %vm178_vm1 = vcmp.lt.s32.totalorder (!%p109_p3), %v525_v5, 8  ;;  %s473_s20 = smov (!%p109_p3), 127   ;;  %s474_s21 = smov (!%p109_p3), 1  }
   0xb   : > { %v183_v13 = vand.u32 (!%p109_p3), 8, %v525_v5  ;;  %v539_v15 = vadd.s32 (!%p109_p3), 256, %v525_v5  ;;  %v221_v36 = vand.u32 (!%p109_p3), 4, %v525_v5  ;;  %vm203_vm6 = vcmp.lt.s32.totalorder (!%p109_p3), %v525_v5, 124 }
   0xc   : > { %v184_v9 = vand.u32 (!%p109_p3), 8, %v528_v6  ;;  %v186_v14 = vand.u32 (!%p109_p3), 8, %v532_v10  ;;  %v222_v37 = vand.u32 (!%p109_p3), 4, %v528_v6  ;;  %vm216_vm7 = vcmp.lt.s32.totalorder (!%p109_p3), %v525_v5, 4 }
   0xd   : > { %vm187_vm3 = vcmp.eq.s32.totalorder (!%p109_p3), %v183_v13, 0  ;;  %v185_v21 = vand.u32 (!%p109_p3), 8, %v539_v15  ;;  %vm225_vm8 = vcmp.eq.s32.totalorder (!%p109_p3), %v221_v36, 0  ;;  %v223_v40 = vand.u32 (!%p109_p3), 4, %v539_v15 }
   0xe   : > { %s664_s6 = smov (!%p133_p4, %s457_s6), 1  ;;  %vm188_vm2 = vcmp.eq.s32.totalorder %v184_v9, 0  ;;  %vm190_vm4 = vcmp.eq.s32.totalorder %v186_v14, 0  ;;  %vm226_vm9 = vcmp.eq.s32.totalorder %v222_v37, 0  ;;  %v224_v41 = vand.u32 4, %v532_v10 }
   0xf   : > { %s408_s10 = sshll.u32 %s664_s6, 5  ;;  %vm189_vm5 = vcmp.eq.s32.totalorder %v185_v21, 0  ;;  %vm227_vm10 = vcmp.eq.s32.totalorder %v223_v40, 0  ;;  %v260_v59 = vand.u32 2, %v528_v6  ;;  %vm254_vm12 = vcmp.lt.s32.totalorder %v525_v5, 2  ;;  %s405_s22 = sshll.u32 %s664_s6, 3 }
  0x10   : > { %s140_s13 = scalar_lea.vmem %s653_s0, %s408_s10  ;;  %vm228_vm11 = vcmp.eq.s32.totalorder %v224_v41, 0  ;;  %v259_v62 = vand.u32 2, %v525_v5  ;;  %v262_v63 = vand.u32 2, %v532_v10  ;;  %vm241_vm14 = vcmp.lt.s32.totalorder %v525_v5, 126  ;;  %s146_s25 = scalar_lea.vmem %s654_s1, %s405_s22 }
  0x11   : > { %v509_v0 = vld [vmem:[%s140_s13 + $0x10] sm:$0xff]  ;;  %v511_v1 = vld [vmem:[%s140_s13] sm:$0xff]  ;;  %v515_v2 = vld [vmem:[%s140_s13 + $0x18] sm:$0xff]  ;;  %vm264_vm13 = vcmp.eq.s32.totalorder %v260_v59, 0 }
  0x12   : > { %161 = vrot.lane.b32.xlu1 %v509_v0, %s467_s14  ;;  %157 = vrot.lane.b32.xlu0 %v511_v1, %s467_s14  ;;  %v517_v3 = vld [vmem:[%s140_s13 + $0x8] sm:$0xff]  ;;  %vm263_vm15 = vcmp.eq.s32.totalorder %v259_v62, 0 }
  0x16   : > { %163 = vrot.lane.b32.xlu1 %v515_v2, %s467_s14  ;;  %159 = vrot.lane.b32.xlu0 %v517_v3, %s467_s14 }
  0x1a   : > { %172 = vrot.lane.b32.xlu1 %v517_v3, %s468_s15  ;;  %170 = vrot.lane.b32.xlu0 %v511_v1, %s468_s15 }
  0x1e   : > { %176 = vrot.lane.b32.xlu1 %v515_v2, %s468_s15  ;;  %174 = vrot.lane.b32.xlu0 %v509_v0, %s468_s15 }
  0x84   : > { %v162_v7 = vpop.permute.xlu1 %161  ;;  %v158_v8 = vpop.permute.xlu0 %157 }
  0x88   : > { %v164_v11 = vpop.permute.xlu1 %163  ;;  %v160_v12 = vpop.permute.xlu0 %159 }
  0x89   : > { %v167_v18 = vsel %vm165_vm0, %v160_v12, %v162_v7  ;;  %v169_v24 = vsel %vm165_vm0, %v164_v11, %v158_v8  ;;  %v168_v25 = vsel %vm165_vm0, %v158_v8, %v160_v12  ;;  %v166_v31 = vsel %vm165_vm0, %v162_v7, %v164_v11 }
  0x8a   : > { %vm266_vm0 = vcmp.eq.s32.totalorder %v262_v63, 0  ;;  %v261_v12 = vand.u32 2, %v539_v15 }
  0x8c   : > { %v173_v16 = vpop.permute.xlu1 %172  ;;  %v171_v17 = vpop.permute.xlu0 %170 }
  0x8d   : > { %v181_v19 = vsel %vm178_vm1, %v171_v17, %v173_v16 }
  0x8e   : > { %v192_v20 = vsel %vm188_vm2, %v167_v18, %v181_v19  ;;  %vm279_vm2 = vcmp.lt.s32.totalorder %v525_v5, 127 }
  0x8f   : > { %197 = vrot.lane.b32.xlu1 %v192_v20, %s469_s16 }
  0x90   : > { %v177_v22 = vpop.permute.xlu1 %176  ;;  %v175_v23 = vpop.permute.xlu0 %174 }
  0x91   : > { %v182_v26 = vsel %vm178_vm1, %v177_v22, %v171_v17  ;;  %v179_v27 = vsel %vm178_vm1, %v175_v23, %v177_v22  ;;  %v180_v30 = vsel %vm178_vm1, %v173_v16, %v175_v23  ;;  %vm265_vm1 = vcmp.eq.s32.totalorder %v261_v12, 0 }
  0x92   : > { %v191_v28 = vsel %vm187_vm3, %v168_v25, %v182_v26  ;;  %v194_v29 = vsel %vm190_vm4, %v169_v24, %v179_v27  ;;  %v193_v32 = vsel %vm189_vm5, %v166_v31, %v180_v30  ;;  %vm292_vm3 = vcmp.lt.s32.totalorder %v525_v5, 1 }
  0x93   : > { %195 = vrot.lane.b32.xlu0 %v191_v28, %s469_s16  ;;  %201 = vrot.lane.b32.xlu1 %v194_v29, %s469_s16 }
  0x97   : > { %199 = vrot.lane.b32.xlu0 %v193_v32, %s469_s16  ;;  %210 = vrot.lane.b32.xlu1 %v192_v20, %s470_s17 }
  0x9b   : > { %208 = vrot.lane.b32.xlu0 %v191_v28, %s470_s17  ;;  %214 = vrot.lane.b32.xlu1 %v194_v29, %s470_s17  ;;  %v297_v28 = vand.u32 1, %v525_v5  ;;  %v298_v29 = vand.u32 1, %v528_v6 }
  0x9d   : > { %vm606_vm4 = vcmp.eq.s32.totalorder %v297_v28, 0  ;;  %vm610_vm5 = vcmp.eq.s32.totalorder %v298_v29, 0 }
  0x9f   : > { %212 = vrot.lane.b32.xlu0 %v193_v32, %s470_s17 }
 0x101   : > { %v198_v33 = vpop.permute.xlu1 %197 }
 0x105   : > { %v202_v34 = vpop.permute.xlu1 %201  ;;  %v196_v35 = vpop.permute.xlu0 %195 }
 0x106   : > { %v206_v44 = vsel %vm203_vm6, %v196_v35, %v198_v33  ;;  %v207_v51 = vsel %vm203_vm6, %v202_v34, %v196_v35  ;;  %v300_v35 = vand.u32 1, %v532_v10 }
 0x109   : > { %v211_v38 = vpop.permute.xlu1 %210  ;;  %v200_v39 = vpop.permute.xlu0 %199 }
 0x10a   : > { %v205_v45 = vsel %vm203_vm6, %v198_v33, %v200_v39  ;;  %v204_v52 = vsel %vm203_vm6, %v200_v39, %v202_v34  ;;  %v299_v34 = vand.u32 1, %v539_v15 }
 0x10c   : > { %vm303_vm6 = vcmp.eq.s32.totalorder %v299_v34, 0 }
 0x10d   : > { %v215_v42 = vpop.permute.xlu1 %214  ;;  %v209_v43 = vpop.permute.xlu0 %208 }
 0x10e   : > { %v219_v46 = vsel %vm216_vm7, %v209_v43, %v211_v38  ;;  %v220_v47 = vsel %vm216_vm7, %v215_v42, %v209_v43 }
 0x10f   : > { %v229_v48 = vsel %vm225_vm8, %v206_v44, %v220_v47  ;;  %v230_v49 = vsel %vm226_vm9, %v205_v45, %v219_v46 }
 0x110   : > { %233 = vrot.lane.b32.xlu0 %v229_v48, %s471_s18  ;;  %235 = vrot.lane.b32.xlu1 %v230_v49, %s471_s18 }
 0x111   : > { %v213_v50 = vpop.permute.xlu0 %212 }
 0x112   : > { %v217_v53 = vsel %vm216_vm7, %v213_v50, %v215_v42  ;;  %v218_v54 = vsel %vm216_vm7, %v211_v38, %v213_v50  ;;  %vm304_vm7 = vcmp.eq.s32.totalorder %v300_v35, 0 }
 0x113   : > { %v231_v55 = vsel %vm227_vm10, %v204_v52, %v218_v54  ;;  %v232_v56 = vsel %vm228_vm11, %v207_v51, %v217_v53 }
 0x114   : > { %237 = vrot.lane.b32.xlu0 %v231_v55, %s471_s18  ;;  %239 = vrot.lane.b32.xlu1 %v232_v56, %s471_s18 }
 0x118   : > { %246 = vrot.lane.b32.xlu0 %v229_v48, %s472_s19  ;;  %248 = vrot.lane.b32.xlu1 %v230_v49, %s472_s19 }
 0x11c   : > { %250 = vrot.lane.b32.xlu0 %v231_v55, %s472_s19  ;;  %252 = vrot.lane.b32.xlu1 %v232_v56, %s472_s19 }
 0x182   : > { %v236_v57 = vpop.permute.xlu1 %235  ;;  %v234_v58 = vpop.permute.xlu0 %233 }
 0x183   : > { %v244_v16 = vsel %vm241_vm14, %v234_v58, %v236_v57 }
 0x186   : > { %v240_v60 = vpop.permute.xlu1 %239  ;;  %v238_v61 = vpop.permute.xlu0 %237 }
 0x187   : > { %v243_v8 = vsel %vm241_vm14, %v236_v57, %v238_v61  ;;  %v245_v17 = vsel %vm241_vm14, %v240_v60, %v234_v58  ;;  %v242_v23 = vsel %vm241_vm14, %v238_v61, %v240_v60 }
 0x18a   : > { %v249_v4 = vpop.permute.xlu1 %248  ;;  %v247_v7 = vpop.permute.xlu0 %246 }
 0x18b   : > { %v257_v9 = vsel %vm254_vm12, %v247_v7, %v249_v4 }
 0x18c   : > { %v268_v11 = vsel %vm264_vm13, %v243_v8, %v257_v9 }
 0x18d   : > { %273 = vrot.lane.b32.xlu1 %v268_v11, %s473_s20 }
 0x18e   : > { %v253_v13 = vpop.permute.xlu1 %252  ;;  %v251_v14 = vpop.permute.xlu0 %250 }
 0x18f   : > { %v258_v18 = vsel %vm254_vm12, %v253_v13, %v247_v7  ;;  %v255_v19 = vsel %vm254_vm12, %v251_v14, %v253_v13  ;;  %v256_v22 = vsel %vm254_vm12, %v249_v4, %v251_v14 }
 0x190   : > { %v267_v20 = vsel %vm263_vm15, %v244_v16, %v258_v18  ;;  %v270_v21 = vsel %vm266_vm0, %v245_v17, %v255_v19  ;;  %v269_v24 = vsel %vm265_vm1, %v242_v23, %v256_v22 }
 0x191   : > { %271 = vrot.lane.b32.xlu0 %v267_v20, %s473_s20  ;;  %277 = vrot.lane.b32.xlu1 %v270_v21, %s473_s20 }
 0x195   : > { %275 = vrot.lane.b32.xlu0 %v269_v24, %s473_s20  ;;  %286 = vrot.lane.b32.xlu1 %v268_v11, %s474_s21 }
 0x199   : > { %284 = vrot.lane.b32.xlu0 %v267_v20, %s474_s21  ;;  %290 = vrot.lane.b32.xlu1 %v270_v21, %s474_s21 }
 0x19d   : > { %288 = vrot.lane.b32.xlu0 %v269_v24, %s474_s21 }
 0x1ff   : > { %v274_v25 = vpop.permute.xlu1 %273 }
 0x203   : > { %v278_v26 = vpop.permute.xlu1 %277  ;;  %v272_v27 = vpop.permute.xlu0 %271 }
 0x204   : > { %v282_v37 = vsel %vm279_vm2, %v272_v27, %v274_v25  ;;  %v283_v15 = vsel %vm279_vm2, %v278_v26, %v272_v27 }
 0x207   : > { %v287_v30 = vpop.permute.xlu1 %286  ;;  %v276_v31 = vpop.permute.xlu0 %275 }
 0x208   : > { %v281_v38 = vsel %vm279_vm2, %v274_v25, %v276_v31  ;;  %v280_v42 = vsel %vm279_vm2, %v276_v31, %v278_v26 }
 0x20b   : > { %v291_v36 = vpop.permute.xlu1 %290  ;;  %v285_v6 = vpop.permute.xlu0 %284 }
 0x20c   : > { %v295_v39 = vsel %vm292_vm3, %v285_v6, %v287_v30  ;;  %v296_v40 = vsel %vm292_vm3, %v291_v36, %v285_v6 }
 0x20d   : > { %v305_v41 = vsel %vm606_vm4, %v282_v37, %v296_v40  ;;  %v306_v10 = vsel %vm610_vm5, %v281_v38, %v295_v39 }
 0x20e   : > { %v309_v44 = vsub.f32 %v511_v1, %v305_v41  ;;  %v310_v45 = vsub.f32 %v517_v3, %v306_v10 }
 0x20f   : > { %v289_v43 = vpop.permute.xlu0 %288 }
 0x210   : > { %v293_v46 = vsel %vm292_vm3, %v289_v43, %v291_v36  ;;  %v294_v47 = vsel %vm292_vm3, %v287_v30, %v289_v43  ;;  %v313_v52 = vmax.f32 %v309_v44, %v310_v45 }
 0x211   : > { %v307_v48 = vsel %vm303_vm6, %v280_v42, %v294_v47  ;;  %v308_v49 = vsel %vm304_vm7, %v283_v15, %v293_v46 }
 0x212   : > { %v311_v50 = vsub.f32 %v509_v0, %v307_v48  ;;  %v312_v51 = vsub.f32 %v515_v2, %v308_v49 }
 0x214   : > { %v314_v53 = vmax.f32 %v311_v50, %v312_v51 }
 0x216   : > { %v315_v54 = vmax.f32 %v313_v52, %v314_v53 }
 0x218   : > { %316 = vmax.xlane.f32.xlu0 %v315_v54 }
 0x2a5   : > { %v317_v1 = vpop.xlane.xlu0 %316 }
 0x2a6   : > { %v318_v55 = vrot.slane %v317_v1, 4 }
 0x2a8   : > { %v319_v3 = vmax.f32 %v317_v1, %v318_v55 }
 0x2aa   : > { %v320_v56 = vrot.slane %v319_v3, 2 }
 0x2ac   : > { %v321_v57 = vmax.f32 %v319_v3, %v320_v56 }
 0x2ae   : > { %v322_v58 = vrot.slane %v321_v57, 1 }
 0x2b0   : > { %v323_v59 = vmax.f32 %v321_v57, %v322_v58 }
 0x2b2   : > { %409 = vpush %v323_v59 }
 0x2e3   : > { %s410_s26 = spop %409 }
 0x2e4   : > { %v325_v0 = vstv %s410_s26 }
 0x2e5   : > { %326 = vst [vmem:[%s146_s25] sm:$0xff] %v325_v0 }
 0x2e6 PF: > { %s11_s8 = sadd.s32 1, %s465_s8   ;;  %s659_s6 = smov %s461_s7 }
 0x2e7   : > { %p8_p5 = scmp.ge.s32.totalorder %s11_s8, 4   ;;  %s660_s7 = smov %s662_s9 }
 0x2e9   :  { %10 = sbr.rel (!%p8_p5) target bundleno = 2 (0x2), region = 54 }

// kernel: sab_forward.3
= control target key start
LH: loop header
LB: loop body
LE: loop exit
PB: predicated region body
PF: predicated region fallthrough
CT: control target
= control target key end

     0   :  { %s934_s15 = smov 0   ;;  %s936_s16 = smov 0   ;;  %s1166_s0 = inlined_call_operand.vmem [shape: f32[2,8,512], index: 0, kind: input, shape index: {}]   ;;  %s1167_s1 = inlined_call_operand.vmem [shape: f32[2,8,512], index: 1, kind: input, shape index: {}]   ;;  %s1168_s2 = inlined_call_operand.vmem [shape: f32[8,8], index: 2, kind: input, shape index: {}]   ;;  %s1169_s3 = inlined_call_operand.vmem [shape: f32[8,1], index: 3, kind: input, shape index: {}]   ;;  %s1170_s4 = inlined_call_operand.vmem [shape: f32[2,16,512], index: 4, kind: output, shape index: {}]  }
   0x1   :  { %s938_s17 = smov 0  }
   0x2 LB: > { %s26_s18 = sadd.s32 1, %s887_s16  ;;  %p807_p0 = scmp.ge.s32.totalorder %s891_s17, 1  ;;  %s891_s17 = sphi %s938_s17, %s14_s17   ;;  %s887_s16 = sphi %s936_s16, %s1172_s16   ;;  %s883_s15 = sphi %s934_s15, %s1171_s15  }
   0x3   : > { %p28_p1 = scmp.ge.s32.totalorder %s26_s18, 2  ;;  %p200_p2 = scmp.lt.s32.totalorder %s891_s17, 3 }
   0x5   : > { %s1174_s18 = smov (%p28_p1, %s26_s18), 0  ;;  %p201_p3 = pnand %p807_p0, %p200_p2 }
   0x6   : > { %p244_p4 = scmp.lt.s32.totalorder (!%p201_p3), %s883_s15, 1  ;;  %s893_s30 = smov (!%p201_p3), 120   ;;  %v277_v8 = vlaneseq (!%p201_p3)  ;;  %v897_v37 = vmov (!%p201_p3), 1   ;;  %v898_v38 = vmov (!%p201_p3), 0   ;;  %v438_v63 = vld [vmem:[%s1168_s2] sm:$0xff] (!%p201_p3) }
   0x7   : > { %204 = sbr.rel (%p201_p3) target bundleno = 571 (0x23b), region = 36  ;;  %s894_s5 = smov (!%p201_p3), 8   ;;  %860 = vset.pattern.permute.xlu1 (!%p201_p3), %v897_v37  ;;  %859 = vset.pattern.permute.xlu0 (!%p201_p3), %v898_v38  ;;  %v907_v37 = vmov (!%p201_p3), 5  }
   0x8   : > { %v984_v9 = vand.u32 (!%p201_p3), 127, %v277_v8  ;;  %s895_s6 = smov (!%p201_p3), 124   ;;  %s896_s7 = smov (!%p201_p3), 4  }
   0x9   : > { %s899_s8 = smov (!%p201_p3), 126   ;;  %s900_s9 = smov (!%p201_p3), 2  }
   0xa   : > { %v987_v11 = vadd.s32 (!%p201_p3), 128, %v984_v9  ;;  %v991_v15 = vadd.s32 (!%p201_p3), 384, %v984_v9  ;;  %vm290_vm0 = vcmp.lt.s32.totalorder (!%p201_p3), %v984_v9, 120  ;;  %vm303_vm1 = vcmp.lt.s32.totalorder (!%p201_p3), %v984_v9, 8  ;;  %s904_s12 = smov (!%p201_p3), 127   ;;  %s905_s13 = smov (!%p201_p3), 1  }
   0xb   : > { %v308_v17 = vand.u32 (!%p201_p3), 8, %v984_v9  ;;  %v997_v18 = vadd.s32 (!%p201_p3), 256, %v984_v9  ;;  %v346_v44 = vand.u32 (!%p201_p3), 4, %v984_v9  ;;  %vm341_vm6 = vcmp.lt.s32.totalorder (!%p201_p3), %v984_v9, 4 }
   0xc   : > { %v309_v14 = vand.u32 (!%p201_p3), 8, %v987_v11  ;;  %v311_v20 = vand.u32 (!%p201_p3), 8, %v991_v15  ;;  %v347_v42 = vand.u32 (!%p201_p3), 4, %v987_v11  ;;  %vm328_vm7 = vcmp.lt.s32.totalorder (!%p201_p3), %v984_v9, 124 }
   0xd   : > { %vm312_vm3 = vcmp.eq.s32.totalorder (!%p201_p3), %v308_v17, 0  ;;  %v310_v25 = vand.u32 (!%p201_p3), 8, %v997_v18  ;;  %v348_v46 = vand.u32 (!%p201_p3), 4, %v997_v18  ;;  %v349_v47 = vand.u32 (!%p201_p3), 4, %v991_v15 }
   0xe   : > { %s1176_s15 = smov (!%p244_p4, %s883_s15), 1  ;;  %vm313_vm2 = vcmp.eq.s32.totalorder %v309_v14, 0  ;;  %vm315_vm4 = vcmp.eq.s32.totalorder %v311_v20, 0  ;;  %vm351_vm8 = vcmp.eq.s32.totalorder %v347_v42, 0  ;;  %vm350_vm9 = vcmp.eq.s32.totalorder %v346_v44, 0 }
   0xf   : > { %s816_s19 = sshll.u32 %s1176_s15, 5  ;;  %s818_s20 = sshll.u32 %s1176_s15, 6  ;;  %vm314_vm5 = vcmp.eq.s32.totalorder %v310_v25, 0  ;;  %vm352_vm10 = vcmp.eq.s32.totalorder %v348_v46, 0  ;;  %vm353_vm11 = vcmp.eq.s32.totalorder %v349_v47, 0  ;;  %vm379_vm12 = vcmp.lt.s32.totalorder %v984_v9, 2 }
  0x10   : > { %s251_s23 = scalar_lea.vmem %s1166_s0, %s816_s19  ;;  %s261_s26 = scalar_lea.vmem %s1167_s1, %s816_s19  ;;  %vm366_vm14 = vcmp.lt.s32.totalorder %v984_v9, 126  ;;  %v423_v47 = vand.u32 1, %v987_v11 }
  0x11   : > { %s961_s29 = scalar_lea.vmem %s1170_s4, %s818_s20  ;;  %v963_v0 = vld [vmem:[%s251_s23 + $0x10] sm:$0xff]  ;;  %v682_v1 = vld [vmem:[%s261_s26] sm:$0xff]  ;;  %v683_v2 = vld [vmem:[%s261_s26 + $0x8] sm:$0xff] }
  0x12   : > { %v684_v3 = vld [vmem:[%s261_s26 + $0x10] sm:$0xff]  ;;  %v685_v4 = vld [vmem:[%s261_s26 + $0x18] sm:$0xff]  ;;  %686 = vst [vmem:[%s961_s29] sm:$0xff] %v682_v1  ;;  %687 = vst [vmem:[%s961_s29 + $0x8] sm:$0xff] %v683_v2  ;;  %v901_v1 = vmov 2   ;;  %v902_v2 = vmov 3  }
  0x13   : > { %286 = vrot.lane.b32.xlu1 %v963_v0, %s893_s30  ;;  %v968_v5 = vld [vmem:[%s251_s23] sm:$0xff]  ;;  %688 = vst [vmem:[%s961_s29 + $0x10] sm:$0xff] %v684_v3  ;;  %689 = vst [vmem:[%s961_s29 + $0x18] sm:$0xff] %v685_v4  ;;  %v903_v3 = vmov 4  }
  0x14   : > { %282 = vrot.lane.b32.xlu0 %v968_v5, %s893_s30  ;;  %v973_v6 = vld [vmem:[%s251_s23 + $0x18] sm:$0xff]  ;;  %v975_v7 = vld [vmem:[%s251_s23 + $0x8] sm:$0xff] }
  0x17   : > { %288 = vrot.lane.b32.xlu1 %v973_v6, %s893_s30 }
  0x18   : > { %284 = vrot.lane.b32.xlu0 %v975_v7, %s893_s30 }
  0x1b   : > { %297 = vrot.lane.b32.xlu1 %v975_v7, %s894_s5 }
  0x1c   : > { %295 = vrot.lane.b32.xlu0 %v968_v5, %s894_s5 }
  0x1f   : > { %301 = vrot.lane.b32.xlu1 %v973_v6, %s894_s5 }
  0x20   : > { %299 = vrot.lane.b32.xlu0 %v963_v0, %s894_s5 }
  0x85   : > { %v287_v10 = vpop.permute.xlu1 %286 }
  0x86   : > { %v283_v12 = vpop.permute.xlu0 %282 }
  0x89   : > { %v289_v13 = vpop.permute.xlu1 %288 }
  0x8a   : > { %v285_v16 = vpop.permute.xlu0 %284  ;;  %v294_v30 = vsel %vm290_vm0, %v289_v13, %v283_v12  ;;  %v291_v35 = vsel %vm290_vm0, %v287_v10, %v289_v13  ;;  %v385_v13 = vand.u32 2, %v987_v11 }
  0x8b   : > { %v292_v22 = vsel %vm290_vm0, %v285_v16, %v287_v10  ;;  %v293_v27 = vsel %vm290_vm0, %v283_v12, %v285_v16  ;;  %v384_v16 = vand.u32 2, %v984_v9 }
  0x8c   : > { %vm389_vm13 = vcmp.eq.s32.totalorder %v385_v13, 0 }
  0x8d   : > { %v298_v19 = vpop.permute.xlu1 %297  ;;  %vm388_vm15 = vcmp.eq.s32.totalorder %v384_v16, 0 }
  0x8e   : > { %v296_v21 = vpop.permute.xlu0 %295 }
  0x8f   : > { %v306_v23 = vsel %vm303_vm1, %v296_v21, %v298_v19 }
  0x90   : > { %v317_v24 = vsel %vm313_vm2, %v292_v22, %v306_v23  ;;  %vm417_vm2 = vcmp.lt.s32.totalorder %v984_v9, 1 }
  0x91   : > { %322 = vrot.lane.b32.xlu1 %v317_v24, %s895_s6  ;;  %v302_v26 = vpop.permute.xlu1 %301 }
  0x92   : > { %v307_v28 = vsel %vm303_vm1, %v302_v26, %v296_v21  ;;  %v300_v29 = vpop.permute.xlu0 %299 }
  0x93   : > { %v304_v31 = vsel %vm303_vm1, %v300_v29, %v302_v26  ;;  %v316_v32 = vsel %vm312_vm3, %v293_v27, %v307_v28  ;;  %v305_v33 = vsel %vm303_vm1, %v298_v19, %v300_v29  ;;  %v387_v19 = vand.u32 2, %v991_v15 }
  0x94   : > { %320 = vrot.lane.b32.xlu0 %v316_v32, %s895_s6  ;;  %v319_v34 = vsel %vm315_vm4, %v294_v30, %v304_v31  ;;  %v318_v36 = vsel %vm314_vm5, %v291_v35, %v305_v33  ;;  %vm404_vm3 = vcmp.lt.s32.totalorder %v984_v9, 127  ;;  %vm427_vm4 = vcmp.eq.s32.totalorder %v423_v47, 0 }
  0x95   : > { %326 = vrot.lane.b32.xlu1 %v319_v34, %s895_s6  ;;  %vm391_vm0 = vcmp.eq.s32.totalorder %v387_v19, 0 }
  0x98   : > { %324 = vrot.lane.b32.xlu0 %v318_v36, %s895_s6 }
  0x99   : > { %335 = vrot.lane.b32.xlu1 %v317_v24, %s896_s7  ;;  %v386_v24 = vand.u32 2, %v997_v18 }
  0x9b   : > { %vm390_vm1 = vcmp.eq.s32.totalorder %v386_v24, 0 }
  0x9c   : > { %333 = vrot.lane.b32.xlu0 %v316_v32, %s896_s7 }
  0x9d   : > { %339 = vrot.lane.b32.xlu1 %v319_v34, %s896_s7 }
  0xa0   : > { %337 = vrot.lane.b32.xlu0 %v318_v36, %s896_s7  ;;  %v906_v36 = vmov 6  }
 0x103   : > { %v323_v39 = vpop.permute.xlu1 %322 }
 0x106   : > { %v321_v40 = vpop.permute.xlu0 %320 }
 0x107   : > { %v327_v41 = vpop.permute.xlu1 %326  ;;  %v331_v52 = vsel %vm328_vm7, %v321_v40, %v323_v39 }
 0x108   : > { %v332_v57 = vsel %vm328_vm7, %v327_v41, %v321_v40  ;;  %v660_v40 = vld [vmem:[%s1169_s3] sm:$0xff] }
 0x10a   : > { %v325_v43 = vpop.permute.xlu0 %324 }
 0x10b   : > { %v336_v45 = vpop.permute.xlu1 %335  ;;  %v330_v49 = vsel %vm328_vm7, %v323_v39, %v325_v43  ;;  %v329_v58 = vsel %vm328_vm7, %v325_v43, %v327_v41  ;;  %v908_v39 = vmov 7  }
 0x10e   : > { %v334_v48 = vpop.permute.xlu0 %333 }
 0x10f   : > { %v340_v50 = vpop.permute.xlu1 %339  ;;  %v344_v51 = vsel %vm341_vm6, %v334_v48, %v336_v45 }
 0x110   : > { %v345_v53 = vsel %vm341_vm6, %v340_v50, %v334_v48  ;;  %v355_v54 = vsel %vm351_vm8, %v330_v49, %v344_v51  ;;  %v422_v49 = vand.u32 1, %v984_v9  ;;  %v445_v51 = vshrl.u32 %v277_v8, 7 }
 0x111   : > { %v354_v55 = vsel %vm350_vm9, %v331_v52, %v345_v53  ;;  %360 = vrot.lane.b32.xlu1 %v355_v54, %s899_s8  ;;  %v425_v52 = vand.u32 1, %v991_v15 }
 0x112   : > { %358 = vrot.lane.b32.xlu0 %v354_v55, %s899_s8  ;;  %v338_v56 = vpop.permute.xlu0 %337  ;;  %vm426_vm5 = vcmp.eq.s32.totalorder %v422_v49, 0  ;;  %v498_v19 = vsub.s32 2, %v445_v51 }
 0x113   : > { %v342_v59 = vsel %vm341_vm6, %v338_v56, %v340_v50  ;;  %v343_v60 = vsel %vm341_vm6, %v336_v45, %v338_v56  ;;  %v446_v56 = vsub.s32 0, %v445_v51  ;;  %vm429_vm7 = vcmp.eq.s32.totalorder %v425_v52, 0 }
 0x114   : > { %v356_v61 = vsel %vm352_vm10, %v329_v58, %v343_v60  ;;  %v357_v62 = vsel %vm353_vm11, %v332_v57, %v342_v59 }
 0x115   : > { %364 = vrot.lane.b32.xlu1 %v357_v62, %s899_s8 }
 0x116   : > { %362 = vrot.lane.b32.xlu0 %v356_v61, %s899_s8 }
 0x119   : > { %373 = vrot.lane.b32.xlu1 %v355_v54, %s900_s9 }
 0x11a   : > { %371 = vrot.lane.b32.xlu0 %v354_v55, %s900_s9 }
 0x11d   : > { %377 = vrot.lane.b32.xlu1 %v357_v62, %s900_s9 }
 0x11e   : > { %375 = vrot.lane.b32.xlu0 %v356_v61, %s900_s9 }
 0x121   : > { %465 = vperm.xlu1 %860, %v438_v63  }
 0x122   : > { %441 = vperm.xlu0 %859, %v438_v63  }
 0x125   : > { %861 = vset.pattern.permute.xlu1 %v901_v1 }
 0x126   : > { %493 = vperm.xlu1 %861, %v438_v63   ;;  %862 = vset.pattern.permute.xlu0 %v902_v2 }
 0x12a   : > { %863 = vset.pattern.permute.xlu1 %v903_v3 }
 0x183   : > { %v361_v4 = vpop.permute.xlu1 %360 }
 0x184   : > { %v359_v10 = vpop.permute.xlu0 %358 }
 0x185   : > { %v369_v26 = vsel %vm366_vm14, %v359_v10, %v361_v4 }
 0x187   : > { %v365_v12 = vpop.permute.xlu1 %364 }
 0x188   : > { %v363_v14 = vpop.permute.xlu0 %362  ;;  %v370_v29 = vsel %vm366_vm14, %v365_v12, %v359_v10 }
 0x189   : > { %v368_v21 = vsel %vm366_vm14, %v361_v4, %v363_v14  ;;  %v367_v34 = vsel %vm366_vm14, %v363_v14, %v365_v12 }
 0x18b   : > { %v374_v17 = vpop.permute.xlu1 %373 }
 0x18c   : > { %v372_v20 = vpop.permute.xlu0 %371 }
 0x18d   : > { %v382_v22 = vsel %vm379_vm12, %v372_v20, %v374_v17 }
 0x18e   : > { %v393_v23 = vsel %vm389_vm13, %v368_v21, %v382_v22 }
 0x18f   : > { %398 = vrot.lane.b32.xlu0 %v393_v23, %s904_s12  ;;  %v378_v25 = vpop.permute.xlu1 %377 }
 0x190   : > { %v383_v27 = vsel %vm379_vm12, %v378_v25, %v372_v20  ;;  %v376_v28 = vpop.permute.xlu0 %375 }
 0x191   : > { %v380_v30 = vsel %vm379_vm12, %v376_v28, %v378_v25  ;;  %v392_v31 = vsel %vm388_vm15, %v369_v26, %v383_v27  ;;  %v381_v32 = vsel %vm379_vm12, %v374_v17, %v376_v28 }
 0x192   : > { %396 = vrot.lane.b32.xlu1 %v392_v31, %s904_s12  ;;  %v395_v33 = vsel %vm391_vm0, %v370_v29, %v380_v30  ;;  %v394_v35 = vsel %vm390_vm1, %v367_v34, %v381_v32 }
 0x193   : > { %402 = vrot.lane.b32.xlu0 %v395_v33, %s904_s12 }
 0x196   : > { %400 = vrot.lane.b32.xlu1 %v394_v35, %s904_s12 }
 0x197   : > { %411 = vrot.lane.b32.xlu0 %v393_v23, %s905_s13 }
 0x19a   : > { %409 = vrot.lane.b32.xlu1 %v392_v31, %s905_s13 }
 0x19b   : > { %415 = vrot.lane.b32.xlu0 %v395_v33, %s905_s13 }
 0x19e   : > { %413 = vrot.lane.b32.xlu1 %v394_v35, %s905_s13  ;;  %v526_v35 = vsub.s32 3, %v445_v51 }
 0x19f   : > { %521 = vperm.xlu0 %862, %v438_v63  }
 0x1a0   : > { %v466_v41 = vpop.permute.xlu1 %465 }
 0x1a1   : > { %v442_v42 = vpop.permute.xlu0 %441 }
 0x1a2   : > { %549 = vperm.xlu1 %863, %v438_v63  }
 0x1a3   : > { %865 = vset.pattern.permute.xlu0 %v906_v36  ;;  %v554_v36 = vsub.s32 4, %v445_v51 }
 0x1a4   : > { %605 = vperm.xlu0 %865, %v438_v63  }
 0x1a5   : > { %v1070_v43 = vpop.permute.xlu1 %493 }
 0x1a6   : > { %864 = vset.pattern.permute.xlu1 %v907_v37  ;;  %v610_v37 = vsub.s32 6, %v445_v51 }
 0x1a7   : > { %577 = vperm.xlu1 %864, %v438_v63  }
 0x1a8   : > { %868 = vset.pattern.permute.xlu0 %v898_v38 }
 0x1ab   : > { %866 = vset.pattern.permute.xlu1 %v908_v39  ;;  %v582_v39 = vsub.s32 5, %v445_v51 }
 0x1ac   : > { %633 = vperm.xlu1 %866, %v438_v63  }
 0x1b0   : > { %867 = vset.pattern.permute.xlu1 %v898_v38  ;;  %v424_v38 = vand.u32 1, %v997_v18  ;;  %v470_v18 = vsub.s32 1, %v445_v51 }
 0x1b1   : > { %663 = vperm.xlu1 %867, %v660_v40   ;;  %v1119_v40 = vsub.s32 7, %v445_v51 }
 0x1b2   : > { %vm428_vm6 = vcmp.eq.s32.totalorder %v424_v38, 0 }
 0x201   : > { %v399_v44 = vpop.permute.xlu0 %398 }
 0x204   : > { %v397_v45 = vpop.permute.xlu1 %396 }
 0x205   : > { %v403_v46 = vpop.permute.xlu0 %402  ;;  %v407_v8 = vsel %vm404_vm3, %v397_v45, %v399_v44 }
 0x206   : > { %v408_v62 = vsel %vm404_vm3, %v403_v46, %v397_v45 }
 0x208   : > { %v401_v48 = vpop.permute.xlu1 %400 }
 0x209   : > { %v412_v50 = vpop.permute.xlu0 %411  ;;  %v406_v11 = vsel %vm404_vm3, %v399_v44, %v401_v48  ;;  %v405_v63 = vsel %vm404_vm3, %v401_v48, %v403_v46 }
 0x20c   : > { %v410_v53 = vpop.permute.xlu1 %409 }
 0x20d   : > { %v420_v54 = vsel %vm417_vm2, %v410_v53, %v412_v50  ;;  %v416_v55 = vpop.permute.xlu0 %415 }
 0x20e   : > { %v431_v57 = vsel %vm427_vm4, %v406_v11, %v420_v54  ;;  %v421_v58 = vsel %vm417_vm2, %v416_v55, %v410_v53 }
 0x20f   : > { %v1088_v15 = vsub.f32 %v975_v7, %v431_v57  ;;  %v430_v59 = vsel %vm426_vm5, %v407_v8, %v421_v58 }
 0x210   : > { %v1091_v60 = vsub.f32 %v968_v5, %v430_v59  ;;  %v414_v61 = vpop.permute.xlu1 %413 }
 0x211   : > { %v418_v1 = vsel %vm417_vm2, %v414_v61, %v416_v55  ;;  %v419_v2 = vsel %vm417_vm2, %v412_v50, %v414_v61  ;;  %v451_v10 = vrot.slane %v1088_v15, %v446_v56  ;;  %v475_v12 = vrot.slane %v1088_v15, %v470_v18 }
 0x212   : > { %v432_v3 = vsel %vm428_vm6, %v405_v63, %v419_v2  ;;  %v433_v4 = vsel %vm429_vm7, %v408_v62, %v418_v1  ;;  %v447_v16 = vrot.slane %v1091_v60, %v446_v56  ;;  %v471_v17 = vrot.slane %v1091_v60, %v470_v18 }
 0x213   : > { %v1104_v13 = vsub.f32 %v963_v0, %v432_v3  ;;  %v1107_v14 = vsub.f32 %v973_v6, %v433_v4  ;;  %v461_v24 = vmul.f32 %v451_v10, %v442_v42  ;;  %v485_v26 = vmul.f32 %v475_v12, %v466_v41 }
 0x214   : > { %v460_v23 = vmul.f32 %v447_v16, %v442_v42  ;;  %v484_v25 = vmul.f32 %v471_v17, %v466_v41  ;;  %v499_v27 = vrot.slane %v1091_v60, %v498_v19  ;;  %v503_v28 = vrot.slane %v1088_v15, %v498_v19 }
 0x215   : > { %v455_v9 = vrot.slane %v1104_v13, %v446_v56  ;;  %v459_v20 = vrot.slane %v1107_v14, %v446_v56  ;;  %v479_v21 = vrot.slane %v1104_v13, %v470_v18  ;;  %v483_v22 = vrot.slane %v1107_v14, %v470_v18 }
 0x216   : > { %v507_v29 = vrot.slane %v1104_v13, %v498_v19  ;;  %v511_v30 = vrot.slane %v1107_v14, %v498_v19  ;;  %v488_v44 = vadd.f32 %v484_v25, %v460_v23  ;;  %v489_v45 = vadd.f32 %v485_v26, %v461_v24 }
 0x217   : > { %v462_v31 = vmul.f32 %v455_v9, %v442_v42  ;;  %v463_v32 = vmul.f32 %v459_v20, %v442_v42  ;;  %v486_v33 = vmul.f32 %v479_v21, %v466_v41  ;;  %v487_v34 = vmul.f32 %v483_v22, %v466_v41 }
 0x218   : > { %v512_v46 = vmul.f32 %v499_v27, %v1070_v43  ;;  %v513_v47 = vmul.f32 %v503_v28, %v1070_v43  ;;  %v514_v50 = vmul.f32 %v507_v29, %v1070_v43  ;;  %v515_v42 = vmul.f32 %v511_v30, %v1070_v43 }
 0x219   : > { %v490_v48 = vadd.f32 %v486_v33, %v462_v31  ;;  %v491_v49 = vadd.f32 %v487_v34, %v463_v32  ;;  %v527_v41 = vrot.slane %v1091_v60, %v526_v35  ;;  %v531_v38 = vrot.slane %v1088_v15, %v526_v35 }
 0x21a   : > { %v535_v52 = vrot.slane %v1104_v13, %v526_v35  ;;  %v539_v51 = vrot.slane %v1107_v14, %v526_v35  ;;  %v555_v11 = vrot.slane %v1091_v60, %v554_v36  ;;  %v559_v54 = vrot.slane %v1088_v15, %v554_v36 }
 0x21b   : > { %v563_v55 = vrot.slane %v1104_v13, %v554_v36  ;;  %v567_v56 = vrot.slane %v1107_v14, %v554_v36  ;;  %v516_v18 = vadd.f32 %v512_v46, %v488_v44  ;;  %v517_v59 = vadd.f32 %v513_v47, %v489_v45 }
 0x21c   : > { %v518_v61 = vadd.f32 %v514_v50, %v490_v48  ;;  %v519_v62 = vadd.f32 %v515_v42, %v491_v49  ;;  %v611_v10 = vrot.slane %v1091_v60, %v610_v37  ;;  %v615_v12 = vrot.slane %v1088_v15, %v610_v37 }
 0x21d   : > { %v619_v16 = vrot.slane %v1104_v13, %v610_v37  ;;  %v623_v17 = vrot.slane %v1107_v14, %v610_v37  ;;  %v583_v23 = vrot.slane %v1091_v60, %v582_v39  ;;  %v587_v24 = vrot.slane %v1088_v15, %v582_v39 }
 0x21e   : > { %v522_v53 = vpop.permute.xlu0 %521  ;;  %v591_v25 = vrot.slane %v1104_v13, %v582_v39  ;;  %v595_v26 = vrot.slane %v1107_v14, %v582_v39  ;;  %v639_v39 = vrot.slane %v1091_v60, %v1119_v40  ;;  %v643_v50 = vrot.slane %v1088_v15, %v1119_v40 }
 0x21f   : > { %v540_v8 = vmul.f32 %v527_v41, %v522_v53  ;;  %v541_v57 = vmul.f32 %v531_v38, %v522_v53  ;;  %v542_v43 = vmul.f32 %v535_v52, %v522_v53  ;;  %v543_v58 = vmul.f32 %v539_v51, %v522_v53 }
 0x220   : > { %v647_v42 = vrot.slane %v1104_v13, %v1119_v40  ;;  %v651_v41 = vrot.slane %v1107_v14, %v1119_v40 }
 0x221   : > { %v550_v63 = vpop.permute.xlu1 %549  ;;  %v544_v19 = vadd.f32 %v540_v8, %v516_v18  ;;  %v545_v9 = vadd.f32 %v541_v57, %v517_v59  ;;  %v546_v20 = vadd.f32 %v542_v43, %v518_v61  ;;  %v547_v21 = vadd.f32 %v543_v58, %v519_v62 }
 0x222   : > { %v568_v1 = vmul.f32 %v555_v11, %v550_v63  ;;  %v569_v2 = vmul.f32 %v559_v54, %v550_v63  ;;  %v570_v3 = vmul.f32 %v563_v55, %v550_v63  ;;  %v571_v4 = vmul.f32 %v567_v56, %v550_v63 }
 0x223   : > { %v606_v22 = vpop.permute.xlu0 %605 }
 0x224   : > { %v572_v27 = vadd.f32 %v568_v1, %v544_v19  ;;  %v573_v28 = vadd.f32 %v569_v2, %v545_v9  ;;  %v574_v29 = vadd.f32 %v570_v3, %v546_v20  ;;  %v575_v30 = vadd.f32 %v571_v4, %v547_v21 }
 0x225   : > { %v624_v36 = vmul.f32 %v611_v10, %v606_v22  ;;  %v625_v37 = vmul.f32 %v615_v12, %v606_v22  ;;  %v626_v44 = vmul.f32 %v619_v16, %v606_v22  ;;  %v627_v45 = vmul.f32 %v623_v17, %v606_v22 }
 0x226   : > { %v578_v31 = vpop.permute.xlu1 %577 }
 0x227   : > { %v596_v32 = vmul.f32 %v583_v23, %v578_v31  ;;  %v597_v33 = vmul.f32 %v587_v24, %v578_v31  ;;  %v598_v34 = vmul.f32 %v591_v25, %v578_v31  ;;  %v599_v35 = vmul.f32 %v595_v26, %v578_v31 }
 0x229   : > { %v600_v46 = vadd.f32 %v596_v32, %v572_v27  ;;  %v601_v47 = vadd.f32 %v597_v33, %v573_v28  ;;  %v602_v48 = vadd.f32 %v598_v34, %v574_v29  ;;  %v603_v49 = vadd.f32 %v599_v35, %v575_v30 }
 0x22b   : > { %v634_v38 = vpop.permute.xlu1 %633  ;;  %v628_v52 = vadd.f32 %v624_v36, %v600_v46  ;;  %v629_v51 = vadd.f32 %v625_v37, %v601_v47  ;;  %v630_v53 = vadd.f32 %v626_v44, %v602_v48  ;;  %v631_v11 = vadd.f32 %v627_v45, %v603_v49 }
 0x22c   : > { %v652_v54 = vmul.f32 %v639_v39, %v634_v38  ;;  %v653_v55 = vmul.f32 %v643_v50, %v634_v38  ;;  %v654_v56 = vmul.f32 %v647_v42, %v634_v38  ;;  %v655_v8 = vmul.f32 %v651_v41, %v634_v38 }
 0x22e   : > { %v656_v57 = vadd.f32 %v652_v54, %v628_v52  ;;  %v657_v60 = vadd.f32 %v653_v55, %v629_v51  ;;  %v658_v43 = vadd.f32 %v654_v56, %v630_v53  ;;  %v659_v58 = vadd.f32 %v655_v8, %v631_v11 }
 0x230   : > { %v664_v15 = vpop.permute.xlu1 %663 }
 0x231   : > { %v666_v18 = vadd.f32 %v664_v15, %v656_v57  ;;  %v667_v59 = vadd.f32 %v664_v15, %v657_v60  ;;  %v668_v13 = vadd.f32 %v664_v15, %v658_v43  ;;  %v669_v61 = vadd.f32 %v664_v15, %v659_v58 }
 0x233   : > { %vm670_vm8 = vcmp.ge.f32.partialorder %v666_v18, 0.0  ;;  %vm671_vm9 = vcmp.ge.f32.partialorder %v667_v59, 0.0  ;;  %vm672_vm10 = vcmp.ge.f32.partialorder %v668_v13, 0.0  ;;  %vm673_vm11 = vcmp.ge.f32.partialorder %v669_v61, 0.0 }
 0x234   : > { %v674_v14 = vmul.f32 0.01, %v666_v18  ;;  %v675_v40 = vmul.f32 0.01, %v667_v59  ;;  %v676_v62 = vmul.f32 0.01, %v668_v13 }
 0x235   : > { %v677_v63 = vmul.f32 0.01, %v669_v61 }
 0x236   : > { %v678_v1 = vsel %vm670_vm8, %v666_v18, %v674_v14  ;;  %v679_v2 = vsel %vm671_vm9, %v667_v59, %v675_v40  ;;  %v680_v3 = vsel %vm672_vm10, %v668_v13, %v676_v62 }
 0x237   : > { %v681_v4 = vsel %vm673_vm11, %v669_v61, %v677_v63  ;;  %v690_v10 = vadd.f32 %v678_v1, %v968_v5  ;;  %v691_v12 = vadd.f32 %v679_v2, %v975_v7  ;;  %v692_v16 = vadd.f32 %v680_v3, %v963_v0 }
 0x238   : > { %v693_v17 = vadd.f32 %v681_v4, %v973_v6 }
 0x239   : > { %694 = vst [vmem:[%s961_s29 + $0x20] sm:$0xff] %v690_v10  ;;  %695 = vst [vmem:[%s961_s29 + $0x28] sm:$0xff] %v691_v12 }
 0x23a   : > { %696 = vst [vmem:[%s961_s29 + $0x30] sm:$0xff] %v692_v16  ;;  %697 = vst [vmem:[%s961_s29 + $0x38] sm:$0xff] %v693_v17 }
 0x23b PF: > { %s14_s17 = sadd.s32 1, %s891_s17   ;;  %s1171_s15 = smov %s887_s16 }
 0x23c   : > { %p11_p5 = scmp.ge.s32.totalorder %s14_s17, 4   ;;  %s1172_s16 = smov %s1174_s18 }
 0x23e   :  { %13 = sbr.rel (!%p11_p5) target bundleno = 2 (0x2), region = 69 }

</bundles_post_ra>
